<compile_context>
chip_gen: v5e
topology: v5e:2x2
jax: 0.10.0
libtpu: 0.0.40
codegen_flags: <defaults>
</compile_context>

<pallas_src>
import math
import functools

import jax
import jax.numpy as jnp
from jax.experimental import pallas as pl
from jax.experimental.pallas import tpu as pltpu


def noisy_linear_kernel(x_ref, wmu_ref, wsig_ref, eps_in_ref, eps_out_ref,
                        b_ref, o_ref, acc_ref):
    k = pl.program_id(2)

    @pl.when(k == 0)
    def _():
        acc_ref[...] = jnp.zeros_like(acc_ref)

    # Contract on the shared in_features axis (axis 1 of both operands) — no
    # transposed copy of the weight tile is ever materialized.
    dn = (((1,), (1,)), ((), ()))

    x = x_ref[...]                                                   # (tm, tk)
    mu_part = jax.lax.dot_general(x, wmu_ref[...], dimension_numbers=dn,
                                  preferred_element_type=jnp.float32)

    # sigma path: (x * eps_in) @ Wsig.T, scaled per output column by eps_out.
    x_noisy = (x.astype(jnp.float32) * eps_in_ref[...]).astype(x.dtype)
    sig_part = jax.lax.dot_general(x_noisy, wsig_ref[...], dimension_numbers=dn,
                                   preferred_element_type=jnp.float32)

    acc_ref[...] += mu_part + sig_part * eps_out_ref[...]            # (tm, tn)

    @pl.when(k == pl.num_programs(2) - 1)
    def _():
        # Bias is added exactly once, in the finalize step.
        o_ref[...] = (acc_ref[...] + b_ref[...]).astype(o_ref.dtype)


def _pad2(a, rows, cols):
    pr, pc = rows - a.shape[0], cols - a.shape[1]
    if pr or pc:
        a = jnp.pad(a, ((0, pr), (0, pc)))
    return a


@functools.partial(jax.jit, static_argnames=("tm", "tn", "tk", "compute_dtype"))
def noisy_linear_forward(x, weight_mu, weight_sigma, bias_mu, bias_sigma,
                         eps_in, eps_out, *, tm=128, tn=256, tk=512,
                         compute_dtype=None):
    """x: (B, in), weight_*: (out, in), bias_*: (out,), eps_in: (in,), eps_out: (out,)."""
    B, K = x.shape
    N, K2 = weight_mu.shape
    assert K2 == K

    if compute_dtype is not None:
        # bf16 streaming for v6e/v7x; accumulation stays f32 inside the kernel.
        x = x.astype(compute_dtype)
        weight_mu = weight_mu.astype(compute_dtype)
        weight_sigma = weight_sigma.astype(compute_dtype)
    out_dtype = x.dtype

    # Clamp tiles to the problem size, then zero-pad every dim to a tile multiple.
    # Zero K-padding contributes nothing to either matmul; padded M/N are sliced off.
    tm, tn, tk = min(tm, B), min(tn, N), min(tk, K)
    gm, gn, gk = pl.cdiv(B, tm), pl.cdiv(N, tn), pl.cdiv(K, tk)
    Bp, Np, Kp = gm * tm, gn * tn, gk * tk

    # Lane-dense (1, X) row vectors (noise math kept in f32 on every generation).
    eps_in_row = eps_in.astype(jnp.float32).reshape(1, K)
    eps_out_row = eps_out.astype(jnp.float32).reshape(1, N)
    bias_row = (bias_mu.astype(jnp.float32)
                + bias_sigma.astype(jnp.float32) * eps_out.astype(jnp.float32)
                ).reshape(1, N)

    x_p = _pad2(x, Bp, Kp)
    wmu_p = _pad2(weight_mu, Np, Kp)
    wsig_p = _pad2(weight_sigma, Np, Kp)
    eps_in_p = _pad2(eps_in_row, 1, Kp)
    eps_out_p = _pad2(eps_out_row, 1, Np)
    bias_p = _pad2(bias_row, 1, Np)

    itemsize = jnp.dtype(x_p.dtype).itemsize
    cost = pl.CostEstimate(
        flops=4 * B * N * K,                       # two matmuls (mu + sigma paths)
        transcendentals=0,
        bytes_accessed=(2 * N * K + B * K + B * N) * itemsize + 3 * N * 4,
    )

    out = pl.pallas_call(
        noisy_linear_kernel,
        out_shape=jax.ShapeDtypeStruct((Bp, Np), out_dtype),
        grid_spec=pltpu.PrefetchScalarGridSpec(
            num_scalar_prefetch=0,
            grid=(gm, gn, gk),                     # K (reduction) innermost
            in_specs=[
                pl.BlockSpec((tm, tk), lambda i, j, k: (i, k)),   # x
                pl.BlockSpec((tn, tk), lambda i, j, k: (j, k)),   # weight_mu
                pl.BlockSpec((tn, tk), lambda i, j, k: (j, k)),   # weight_sigma
                pl.BlockSpec((1, tk), lambda i, j, k: (0, k)),    # eps_in (row)
                pl.BlockSpec((1, tn), lambda i, j, k: (0, j)),    # eps_out (row)
                pl.BlockSpec((1, tn), lambda i, j, k: (0, j)),    # fused bias (row)
            ],
            out_specs=pl.BlockSpec((tm, tn), lambda i, j, k: (i, j)),
            scratch_shapes=[pltpu.VMEM((tm, tn), jnp.float32)],
        ),
        compiler_params=pltpu.CompilerParams(
            dimension_semantics=("parallel", "parallel", "arbitrary")),
        cost_estimate=cost,
    )(x_p, wmu_p, wsig_p, eps_in_p, eps_out_p, bias_p)

    return out[:B, :N]


def scale_noise(key, size):
    z = jax.random.normal(key, (size,), dtype=jnp.float32)
    return jnp.sign(z) * jnp.sqrt(jnp.abs(z))


if __name__ == "__main__":
    # Small but lane-dense shapes (out multiple of 128 avoids masked stores);
    # tn/tk chosen so the demo exercises the N-parallel and K-reduction grid axes.
    batch, in_features, out_features = 8, 512, 256
    sigma_init = 0.017

    key = jax.random.PRNGKey(0)
    k_x, k_wmu, k_bmu, k_ein, k_eout = jax.random.split(key, 5)

    # Deterministic parameter init (mirrors reset_parameters).
    mu_range = 1.0 / math.sqrt(in_features)
    weight_mu = jax.random.uniform(k_wmu, (out_features, in_features),
                                   minval=-mu_range, maxval=mu_range,
                                   dtype=jnp.float32)
    bias_mu = jax.random.uniform(k_bmu, (out_features,),
                                 minval=-mu_range, maxval=mu_range,
                                 dtype=jnp.float32)
    weight_sigma = jnp.full((out_features, in_features), sigma_init, jnp.float32)
    bias_sigma = jnp.full((out_features,), sigma_init, jnp.float32)

    # Factorized noise (reset_noise), sampled deterministically here.
    # TODO(synk): noise is sampled with jax.random in the wrapper, not in-kernel PRNG.
    eps_in = scale_noise(k_ein, in_features)
    eps_out = scale_noise(k_eout, out_features)

    x = jax.random.normal(k_x, (batch, in_features), dtype=jnp.float32)

    y = noisy_linear_forward(x, weight_mu, weight_sigma, bias_mu, bias_sigma,
                             eps_in, eps_out, tm=128, tn=128, tk=256)
    y = jax.block_until_ready(y)

    # Pure-JAX reference check (training-mode semantics, bias_epsilon == eps_out).
    w_ref = weight_mu + weight_sigma * jnp.outer(eps_out, eps_in)
    b_ref = bias_mu + bias_sigma * eps_out
    y_ref = x @ w_ref.T + b_ref
    assert y.shape == (batch, out_features)
    assert jnp.allclose(y, y_ref, atol=2e-3, rtol=2e-3), \
        float(jnp.max(jnp.abs(y - y_ref)))

    print("KERNEL_OK")
</pallas_src>

<mosaic_0001>
module attributes {stable_mosaic.version = 11 : i64} {
  func.func @noisy_linear_kernel(%arg0: i32, %arg1: i32, %arg2: i32, %arg3: memref<8x256xf32, #tpu.memory_space<vmem>>, %arg4: memref<128x256xf32, #tpu.memory_space<vmem>>, %arg5: memref<128x256xf32, #tpu.memory_space<vmem>>, %arg6: memref<1x256xf32, #tpu.memory_space<vmem>>, %arg7: memref<1x128xf32, #tpu.memory_space<vmem>>, %arg8: memref<1x128xf32, #tpu.memory_space<vmem>>, %arg9: memref<8x128xf32, #tpu.memory_space<vmem>>, %arg10: memref<8x128xf32, #tpu.memory_space<vmem>>) attributes {dimension_semantics = [#tpu.dimension_semantics<parallel>, #tpu.dimension_semantics<parallel>, #tpu.dimension_semantics<arbitrary>], iteration_bounds = array<i64: 1, 2, 2>, scalar_prefetch = 0 : i64, scratch_operands = 1 : i64, tpu.core_type = #tpu.core_type<tc>, window_params = [{transform_indices = @transform_0, window_bounds = array<i64: 8, 256>}, {transform_indices = @transform_1, window_bounds = array<i64: 128, 256>}, {transform_indices = @transform_2, window_bounds = array<i64: 128, 256>}, {transform_indices = @transform_3, window_bounds = array<i64: 1, 256>}, {transform_indices = @transform_4, window_bounds = array<i64: 1, 128>}, {transform_indices = @transform_5, window_bounds = array<i64: 1, 128>}, {transform_indices = @transform_6, window_bounds = array<i64: 8, 128>}]} {
    %c0_i32 = arith.constant 0 : i32
    %0 = arith.cmpi eq, %arg2, %c0_i32 : i32
    %1 = arith.extui %0 : i1 to i32
    %c0_i32_0 = arith.constant 0 : i32
    %2 = arith.cmpi ne, %1, %c0_i32_0 : i32
    scf.if %2 {
      %cst_16 = arith.constant 0.000000e+00 : f32
      %21 = vector.broadcast %cst_16 : f32 to vector<8x128xf32>
      %c0_17 = arith.constant 0 : index
      %c0_18 = arith.constant 0 : index
      %22 = vector.load %arg10[%c0_17, %c0_18] : memref<8x128xf32, #tpu.memory_space<vmem>>, vector<8x128xf32>
      tpu.vector_store %arg10[%c0_17, %c0_18], %21 {strides = array<i32>} : memref<8x128xf32, #tpu.memory_space<vmem>>, vector<8x128xf32>,
    } else {
    }
    %c0 = arith.constant 0 : index
    %c0_1 = arith.constant 0 : index
    %3 = vector.load %arg3[%c0, %c0_1] : memref<8x256xf32, #tpu.memory_space<vmem>>, vector<8x256xf32>
    %c0_2 = arith.constant 0 : index
    %c0_3 = arith.constant 0 : index
    %4 = vector.load %arg4[%c0_2, %c0_3] : memref<128x256xf32, #tpu.memory_space<vmem>>, vector<128x256xf32>
    %cst = arith.constant dense<0.000000e+00> : vector<8x128xf32>
    %5 = tpu.matmul %3, %4, %cst {dimension_numbers = #tpu.dot_dimension_numbers<[1], [1], [0], [0], [0, 0, 1, 0], [], []>} : vector<8x256xf32>, vector<128x256xf32>, vector<8x128xf32> -> vector<8x128xf32>
    %c0_4 = arith.constant 0 : index
    %c0_5 = arith.constant 0 : index
    %6 = vector.load %arg6[%c0_4, %c0_5] : memref<1x256xf32, #tpu.memory_space<vmem>>, vector<1x256xf32>
    %7 = vector.broadcast %6 : vector<1x256xf32> to vector<8x256xf32>
    %8 = arith.mulf %3, %7 : vector<8x256xf32>
    %c0_6 = arith.constant 0 : index
    %c0_7 = arith.constant 0 : index
    %9 = vector.load %arg5[%c0_6, %c0_7] : memref<128x256xf32, #tpu.memory_space<vmem>>, vector<128x256xf32>
    %cst_8 = arith.constant dense<0.000000e+00> : vector<8x128xf32>
    %10 = tpu.matmul %8, %9, %cst_8 {dimension_numbers = #tpu.dot_dimension_numbers<[1], [1], [0], [0], [0, 0, 1, 0], [], []>} : vector<8x256xf32>, vector<128x256xf32>, vector<8x128xf32> -> vector<8x128xf32>
    %c0_9 = arith.constant 0 : index
    %c0_10 = arith.constant 0 : index
    %11 = vector.load %arg10[%c0_9, %c0_10] : memref<8x128xf32, #tpu.memory_space<vmem>>, vector<8x128xf32>
    %c0_11 = arith.constant 0 : index
    %c0_12 = arith.constant 0 : index
    %12 = vector.load %arg7[%c0_11, %c0_12] : memref<1x128xf32, #tpu.memory_space<vmem>>, vector<1x128xf32>
    %13 = vector.broadcast %12 : vector<1x128xf32> to vector<8x128xf32>
    %14 = arith.mulf %10, %13 : vector<8x128xf32>
    %15 = arith.addf %5, %14 : vector<8x128xf32>
    %16 = arith.addf %11, %15 : vector<8x128xf32>
    %c0_13 = arith.constant 0 : index
    %c0_14 = arith.constant 0 : index
    %17 = vector.load %arg10[%c0_13, %c0_14] : memref<8x128xf32, #tpu.memory_space<vmem>>, vector<8x128xf32>
    tpu.vector_store %arg10[%c0_13, %c0_14], %16 {strides = array<i32>} : memref<8x128xf32, #tpu.memory_space<vmem>>, vector<8x128xf32>,
    %c1_i32 = arith.constant 1 : i32
    %18 = arith.cmpi eq, %arg2, %c1_i32 : i32
    %19 = arith.extui %18 : i1 to i32
    %c0_i32_15 = arith.constant 0 : i32
    %20 = arith.cmpi ne, %19, %c0_i32_15 : i32
    scf.if %20 {
      %c0_16 = arith.constant 0 : index
      %c0_17 = arith.constant 0 : index
      %21 = vector.load %arg10[%c0_16, %c0_17] : memref<8x128xf32, #tpu.memory_space<vmem>>, vector<8x128xf32>
      %c0_18 = arith.constant 0 : index
      %c0_19 = arith.constant 0 : index
      %22 = vector.load %arg8[%c0_18, %c0_19] : memref<1x128xf32, #tpu.memory_space<vmem>>, vector<1x128xf32>
      %23 = vector.broadcast %22 : vector<1x128xf32> to vector<8x128xf32>
      %24 = arith.addf %21, %23 : vector<8x128xf32>
      %c0_20 = arith.constant 0 : index
      %c0_21 = arith.constant 0 : index
      %25 = vector.load %arg9[%c0_20, %c0_21] : memref<8x128xf32, #tpu.memory_space<vmem>>, vector<8x128xf32>
      tpu.vector_store %arg9[%c0_20, %c0_21], %24 {strides = array<i32>} : memref<8x128xf32, #tpu.memory_space<vmem>>, vector<8x128xf32>,
    } else {
    }
    return
  }
  func.func @transform_0(%arg0: i32, %arg1: i32, %arg2: i32) -> (i32, i32) {
    %c0_i32 = arith.constant 0 : i32
    return %arg0, %arg2 : i32, i32
  }
  func.func @transform_1(%arg0: i32, %arg1: i32, %arg2: i32) -> (i32, i32) {
    %c0_i32 = arith.constant 0 : i32
    return %arg1, %arg2 : i32, i32
  }
  func.func @transform_2(%arg0: i32, %arg1: i32, %arg2: i32) -> (i32, i32) {
    %c0_i32 = arith.constant 0 : i32
    return %arg1, %arg2 : i32, i32
  }
  func.func @transform_3(%arg0: i32, %arg1: i32, %arg2: i32) -> (i32, i32) {
    %c0_i32 = arith.constant 0 : i32
    %c0_i32_0 = arith.constant 0 : i32
    return %c0_i32, %arg2 : i32, i32
  }
  func.func @transform_4(%arg0: i32, %arg1: i32, %arg2: i32) -> (i32, i32) {
    %c0_i32 = arith.constant 0 : i32
    %c0_i32_0 = arith.constant 0 : i32
    return %c0_i32, %arg1 : i32, i32
  }
  func.func @transform_5(%arg0: i32, %arg1: i32, %arg2: i32) -> (i32, i32) {
    %c0_i32 = arith.constant 0 : i32
    %c0_i32_0 = arith.constant 0 : i32
    return %c0_i32, %arg1 : i32, i32
  }
  func.func @transform_6(%arg0: i32, %arg1: i32, %arg2: i32) -> (i32, i32) {
    %c0_i32 = arith.constant 0 : i32
    return %arg0, %arg1 : i32, i32
  }
}

</mosaic_0001>

<bundles_post_ra>
// kernel: noisy_linear_forward.1
= control target key start
LH: loop header
LB: loop body
LE: loop exit
PB: predicated region body
PF: predicated region fallthrough
CT: control target
= control target key end

     0   :  { %s1650_s0 = inlined_call_operand.hbm [shape: f32[8,512], index: 0, kind: input, shape index: {}]   ;;  %s1651_s1 = inlined_call_operand.hbm [shape: f32[256,512], index: 1, kind: input, shape index: {}]   ;;  %s1652_s2 = inlined_call_operand.hbm [shape: f32[256,512], index: 2, kind: input, shape index: {}]   ;;  %s1653_s3 = inlined_call_operand.vmem [shape: f32[1,512], index: 3, kind: input, shape index: {}]   ;;  %s1654_s4 = inlined_call_operand.vmem [shape: f32[1,256], index: 4, kind: input, shape index: {}]   ;;  %s1655_s5 = inlined_call_operand.vmem [shape: f32[1,256], index: 5, kind: input, shape index: {}]   ;;  %s1656_s6 = inlined_call_operand.hbm [shape: f32[8,256], index: 6, kind: output, shape index: {}]  }
   0x1   :  { %1672 = sst [smem:[#allocation25_spill]] %s1651_s1 }
   0x2   :  { %1673 = sst [smem:[#allocation26_spill]] %s1652_s2 }
   0x3   :  { %1674 = sst [smem:[#allocation27_spill]] %s1653_s3 }
   0x4   :  { %1675 = sst [smem:[#allocation28_spill]] %s1654_s4 }
   0x5   :  { %1676 = sst [smem:[#allocation29_spill]] %s1655_s5 }
   0x6   :  { %1677 = sst [smem:[#allocation30_spill]] %s1656_s6 }
   0x7   :  { %11 = vsyncpa [#allocation4], 0 }
   0x8   :  { %13 = vsyncpa [#allocation4 + $0x1], 0 }
   0x9   :  { %14 = vsyncpa [#allocation7], 0 }
   0xa   :  { %16 = vsyncpa [#allocation7 + $0x1], 0 }
   0xb   :  { %17 = vsyncpa [#allocation5], 0 }
   0xc   :  { %19 = vsyncpa [#allocation5 + $0x1], 0  ;;  %s1254_s21 = smov 0   ;;  %s1256_s22 = smov 0  }
   0xd   :  { %s1258_s23 = smov 0   ;;  %s1260_s24 = smov 0  }
   0xe   :  { %s1262_s25 = smov 0   ;;  %s1264_s26 = smov 0  }
   0xf   :  { %s1266_s27 = smov 0   ;;  %s1268_s28 = smov 0  }
  0x10   :  { %s1270_s29 = smov 0   ;;  %s1272_s30 = smov 0  }
  0x11   :  { %s1274_s7 = smov 0   ;;  %s1276_s8 = smov 0  }
  0x12   :  { %s1278_s9 = smov 0   ;;  %s1280_s10 = smov 0  }
  0x13 LB: > { %1678 = sst [smem:[#allocation13_spill]] %s1161_s21  ;;  %p61_p0 = scmp.eq.s32.totalorder %s1213_s10, 0  ;;  %s1213_s10 = sphi %s1280_s10, %s25_s10   ;;  %s1209_s9 = sphi %s1278_s9, %s1735_s9   ;;  %s1205_s8 = sphi %s1276_s8, %s1734_s8   ;;  %s1201_s7 = sphi %s1274_s7, %s1724_s7   ;;  %s1197_s30 = sphi %s1272_s30, %s1733_s30   ;;  %s1193_s29 = sphi %s1270_s29, %s1723_s29   ;;  %s1189_s28 = sphi %s1268_s28, %s1732_s28   ;;  %s1185_s27 = sphi %s1266_s27, %s1731_s27   ;;  %s1181_s26 = sphi %s1264_s26, %s1721_s26   ;;  %s1177_s25 = sphi %s1262_s25, %s1730_s25   ;;  %s1173_s24 = sphi %s1260_s24, %s1729_s24   ;;  %s1169_s23 = sphi %s1258_s23, %s1719_s23   ;;  %s1165_s22 = sphi %s1256_s22, %s1728_s22   ;;  %s1161_s21 = sphi %s1254_s21, %s1727_s21  }
  0x14   : > { %1679 = sst [smem:[#allocation14_spill]] %s1169_s23  ;;  %p88_p1 = scmp.ne.s32.totalorder %s1181_s26, %s1177_s25 }
  0x15   : > { %1680 = sst [smem:[#allocation15_spill]] %s1181_s26  ;;  %p853_p2 = scmp.lt.s32.totalorder %s1213_s10, 4 }
  0x16   : > { %1681 = sst [smem:[#allocation16_spill]] %s1193_s29  ;;  %p90_p3 = por %p88_p1, %p61_p0 }
  0x17   : > { %1682 = sst [smem:[#allocation17_spill]] %s1209_s9  ;;  %s274_s13 = sand.u32 1, %s1213_s10  }
  0x18   : > { %s276_s14 = sand.u32 1, %s1181_s26   ;;  %s808_s16 = sshll.u32 %s1205_s8, 1 }
  0x19   : > { %s806_s15 = sshll.u32 %s276_s14, 8  ;;  %s829_s17 = sshll.u32 %s1209_s9, 6 }
  0x1a   : > { %s284_s18 = sadd.s32 %s829_s17, %s808_s16  ;;  %s278_s19 = scalar_lea.vmem [#allocation6], %s806_s15 }
  0x1b   : > { %s289_s20 = sshll.u32 %s278_s19, 4  ;;  %s810_s6 = sshll.u32 %s284_s18, 3  ;;  %s290_s20 = int_to_ptr.vmem [resolvable:$true] %s289_s20 }
  0x1c   : > { %s1683_s1 = sld [smem:[#allocation25_spill]]  ;;  %p1341_p4 = pnand %p853_p2, %p90_p3 }
  0x1d   : > { %s1345_s16 = scalar_lea.sflag [#allocation7], %s274_s13  ;;  %s1658_s17 = smov 512  }
  0x1e   : > { %s1659_s18 = smov 256   ;;  %s1660_s4 = smov 16  }
  0x1f   : > { %s1685_s2 = sld [smem:[#allocation26_spill]]  ;;  %p816_p5 = scmp.ge.s32.totalorder %s1213_s10, 1 }
  0x20   : > { %p342_p6 = scmp.lt.s32.totalorder %s1213_s10, 5  ;;  %p60_p9 = scmp.ne.s32.totalorder %s1193_s29, %s1189_s28 }
  0x21   : > { %p66_p10 = scmp.ne.s32.totalorder %s1189_s28, %s1185_s27  ;;  %s1689_s5 = sadd.s32 1, %s1209_s9 }
  0x22   : > { %s286_s11 = scalar_lea.hbm %s1683_s1, %s810_s6  ;;  %s303_s1 = scalar_lea.vmem [#allocation8], %s806_s15 }
  0x23   : > { %s287_s14 = sshll.u32 %s286_s11, 4  ;;  %s1356_s3 = sshll.u32 %s303_s1, 4  ;;  %s288_s14 = int_to_ptr.hbm [resolvable:$true] %s287_s14 }
  0x24   : > { %845 = dma.hbm_to_vmem [thread:$0]  (!%p1341_p4), %s288_s14, 4096, %s290_s20, %s1345_s16, %s1658_s17, %s1659_s18, %s1660_s4  }
  0x25   : > { %s311_s13 = scalar_lea.hbm %s1685_s2, %s810_s6  ;;  %1686 = sst [smem:[#allocation18_spill]] %s1356_s3 }
  0x26   : > { %s312_s19 = sshll.u32 %s311_s13, 4  ;;  %p1363_p7 = pnand %p816_p5, %p342_p6  ;;  %s1358_s19 = int_to_ptr.hbm [resolvable:$true] %s312_s19 }
  0x27   : > { %s1368_s6 = sadd.s32 4294967295, %s1213_s10   ;;  %s800_s15 = sadd.s32 4294967294, %s1213_s10  }
  0x28   : > { %s37_s1 = sadd.s32 1, %s1205_s8  ;;  %s53_s14 = sadd.s32 1, %s1193_s29 }
  0x29   : > { %p38_p8 = scmp.ge.s32.totalorder %s37_s1, 2  ;;  %p1386_p11 = por %p61_p0, %p60_p9 }
  0x2a   : > { %p67_p1 = scmp.eq.s32.totalorder %s1368_s6, 0  ;;  %p94_p3 = scmp.ne.s32.totalorder %s1177_s25, %s1173_s24 }
  0x2b   : > { %s1737_s1 = smov (%p38_p8, %s37_s1), 0  ;;  %s1739_s5 = smov (!%p38_p8, %s1689_s5), %s1209_s9 }
  0x2c   : > { %1688 = sst [smem:[#allocation19_spill]] %s1737_s1  ;;  %s49_s11 = ssub.s32 %s1205_s8, %s1737_s1 }
  0x2d   : > { %p42_p12 = scmp.ge.s32.totalorder %s1739_s5, 2  ;;  %p51_p13 = scmp.eq.s32.totalorder %s49_s11, 0 }
  0x2e   : > { %p1398_p5 = por %p67_p1, %p66_p10  ;;  %p1404_p0 = por %p94_p3, %p67_p1 }
  0x2f   : > { %s1741_s5 = smov (%p42_p12, %s1739_s5), 0  ;;  %s215_s24 = sadd.s32 1, %s1169_s23 }
  0x30   : > { %1691 = sst [smem:[#allocation20_spill]] %s1741_s5  ;;  %s76_s18 = ssub.s32 %s1209_s9, %s1741_s5 }
  0x31   : > { %s1396_s27 = scalar_select %p51_p13, %s1193_s29, %s53_s14  }
  0x32   : > { %s78_s4 = sor.u32 %s76_s18, %s49_s11  ;;  %p213_p8 = scmp.eq.s32.totalorder %s76_s18, 0 }
  0x33   : > { %1692 = sst [smem:[#allocation21_spill]] %s1396_s27  ;;  %p79_p6 = scmp.eq.s32.totalorder %s78_s4, 0 }
  0x34   : > { %p225_p9 = scmp.ne.s32.totalorder %s1169_s23, %s1165_s22  ;;  %s1695_s2 = sadd.s32 1, %s1181_s26 }
  0x35   : > { %s1414_s1 = scalar_select %p79_p6, %s1181_s26, %s1695_s2  }
  0x36   : > { %s1417_s14 = scalar_select %p213_p8, %s1169_s23, %s215_s24  }
  0x37   : > { %1696 = sst [smem:[#allocation22_spill]] %s1414_s1  ;;  %p226_p10 = scmp.eq.s32.totalorder %s1368_s6, 3 }
  0x38   : > { %1697 = sst [smem:[#allocation23_spill]] %s1417_s14  ;;  %p231_p12 = scmp.ne.s32.totalorder %s1165_s22, %s1161_s21 }
  0x39   : > { %s1698_s5 = sld [smem:[#allocation18_spill]]  ;;  %p232_p13 = scmp.eq.s32.totalorder %s800_s15, 3 }
  0x3a   : > { %s252_s11 = sand.u32 1, %s1193_s29   ;;  %p1423_p1 = por %p226_p10, %p225_p9 }
  0x3b   : > { %p1427_p3 = por %p232_p13, %p231_p12  ;;  %s803_s2 = sshll.u32 %s252_s11, 4 }
  0x3c   : > { %s1699_s4 = scalar_select %p1423_p1, 1, 0 }
  0x3d   : > { %s1701_s18 = scalar_select %p1427_p3, 1, 0 }
  0x3e   : > { %1700 = sst [smem:[#allocation18_spill]] %s1699_s4  ;;  %s828_s9 = sshll.u32 %s1205_s8, 4 }
  0x3f   : > { %1702 = sst [smem:[#allocation24_spill]] %s1701_s18  ;;  %s263_s1 = scalar_lea.hbm %s1650_s0, %s828_s9 }
  0x40   : > { %s256_s26 = scalar_lea.vmem [#allocation3], %s803_s2  ;;  %s265_s23 = sshll.u32 %s263_s1, 4  ;;  %s266_s23 = int_to_ptr.hbm [resolvable:$true] %s265_s23 }
  0x41   : > { %s267_s14 = sshll.u32 %s256_s26, 4  ;;  %p840_p6 = pnand %p853_p2, %p1386_p11  ;;  %s268_s14 = int_to_ptr.vmem [resolvable:$true] %s267_s14 }
  0x42   : > { %s1703_s15 = smov 16   ;;  %s1704_s29 = smov 256  }
  0x43   : > { %s1705_s21 = smov 512   ;;  %s1706_s4 = int_to_ptr.vmem [resolvable:$true] %s1698_s5 }
  0x44   : > { %848 = dma.hbm_to_vmem [thread:$0]  (!%p1341_p4), %s1358_s19, 4096, %s1706_s4, %s1345_s16, %s1705_s21, %s1704_s29, %s1703_s15  }
  0x45   : > { %s253_s18 = scalar_lea.sflag [#allocation4], %s252_s11  ;;  %346 = sbr.rel (%p1363_p7) target bundleno = 327 (0x147), region = 44 }
  0x46   : > { %842 = dma.hbm_to_vmem [thread:$0]  (!%p840_p6), %s266_s23, 256, %s268_s14, %s253_s18  }
  0x47   : > { %s348_s26 = sand.u32 (!%p1363_p7), 1, %s1189_s28  }
  0x48   : > { %s1451_s9 = sshll.u32 (!%p1363_p7), %s348_s26, 4  ;;  %s349_s1 = scalar_lea.sflag (!%p1363_p7), [#allocation4], %s348_s26 }
  0x49   : > { %s352_s13 = scalar_lea.vmem (!%p1363_p7), [#allocation3], %s1451_s9 }
  0x4a   : > { %1148 = dma.done.wait (%p1398_p5), %s349_s1, 256  }
  0x4b   : > { %1150 = vsyncadd (%p1398_p5), %s349_s1, 4294967040  ;;  %s358_s21 = sand.u32 1, %s1368_s6   ;;  %s360_s23 = sand.u32 1, %s1177_s25  }
  0x4c   : > { %s818_s29 = sshll.u32 %s360_s23, 8  ;;  %s359_s12 = scalar_lea.sflag [#allocation7], %s358_s21 }
  0x4d   : > { %s1460_s16 = scalar_lea.vmem [#allocation6], %s818_s29 }
  0x4e   : > { %1152 = dma.done.wait (%p1404_p0), %s359_s12, 8192  }
  0x4f   : > { %1154 = vsyncadd (%p1404_p0), %s359_s12, 4294959104  ;;  %s419_s17 = sand.u32 1, %s1165_s22   ;;  %s821_s20 = sshll.u32 %s1197_s30, 1 }
  0x50   : > { %s1469_s19 = sshll.u32 %s419_s17, 3  ;;  %p428_p2 = scmp.lt.s32.totalorder %s821_s20, 3 }
  0x51   : > { %p432_p4 = scmp.lt.s32.totalorder %s1201_s7, 1  ;;  %s1707_s27 = sld [smem:[#allocation27_spill]] }
  0x52   : > { %s1743_s20 = smov (!%p428_p2, %s821_s20), 3  ;;  %s1708_s18 = sld [smem:[#allocation28_spill]] }
  0x53   : > { %s1476_s6 = scalar_select %p432_p4, %s1201_s7, 1 }
  0x54   : > { %s1709_s26 = sld [smem:[#allocation29_spill]]  ;;  %s1490_s21 = scalar_lea.vmem [#allocation8], %s818_s29 }
  0x55   : > { %s421_s23 = scalar_lea.vmem [#allocation9], %s1469_s19  ;;  %p822_p7 = scmp.ne.s32.totalorder %s1197_s30, 0 }
  0x57   : > { %s430_s14 = scalar_lea.vmem %s1707_s27, %s1743_s20  ;;  %441 = sbr.rel (%p822_p7) target bundleno = 94 (0x5e), region = 60 }
  0x58   : > { %s434_s2 = scalar_lea.vmem %s1708_s18, %s1476_s6 }
  0x5a   : > { %s437_s1 = scalar_lea.vmem %s1709_s26, %s1476_s6 }
  0x5c   : > { %v1218_v0 = vmov 0.0  }
  0x5d   : > { %442 = vst [vmem:[#allocation2] sm:$0xff] %v1218_v0 }
  0x5e PF: > { %v475_v1 = vld [vmem:[%s1460_s16 + $0xf0] sm:$0xff]  ;;  %v516_v3 = vld [vmem:[%s1490_s21 + $0xf8] sm:$0xff]  ;;  %v473_v5 = vld [vmem:[%s1460_s16 + $0xe0] sm:$0xff]  ;;  %p823_p11 = scmp.ne.s32.totalorder %s1197_s30, 1 }
  0x5f   : > { %v515_v2 = vld [vmem:[%s1490_s21 + $0xf0] sm:$0xff]  ;;  %563 = vmatpush.xpose.msra.mxu2 %v475_v1  ;;  %v476_v4 = vld [vmem:[%s1460_s16 + $0xf8] sm:$0xff]  ;;  %537 = vmatpush.xpose.msra.mxu1 %v516_v3  ;;  %v513_v6 = vld [vmem:[%s1490_s21 + $0xe0] sm:$0xff] }
  0x60   : > { %517 = vmatpush.xpose.msra.mxu0 %v515_v2  ;;  %583 = vmatpush.xpose.msra.mxu3 %v476_v4  ;;  %v514_v7 = vld [vmem:[%s1490_s21 + $0xe8] sm:$0xff]  ;;  %v471_v9 = vld [vmem:[%s1460_s16 + $0xd0] sm:$0xff]  ;;  %v512_v11 = vld [vmem:[%s1490_s21 + $0xd8] sm:$0xff] }
  0x61   : > { %v474_v8 = vld [vmem:[%s1460_s16 + $0xe8] sm:$0xff]  ;;  %v511_v10 = vld [vmem:[%s1490_s21 + $0xd0] sm:$0xff]  ;;  %v472_v12 = vld [vmem:[%s1460_s16 + $0xd8] sm:$0xff] }
  0x62   : > { %v469_v13 = vld [vmem:[%s1460_s16 + $0xc0] sm:$0xff]  ;;  %v510_v15 = vld [vmem:[%s1490_s21 + $0xc8] sm:$0xff]  ;;  %v467_v17 = vld [vmem:[%s1460_s16 + $0xb0] sm:$0xff] }
  0x63   : > { %564 = vmatpush.xpose.msra.mxu2 %v473_v5  ;;  %538 = vmatpush.xpose.msra.mxu1 %v514_v7  ;;  %v509_v14 = vld [vmem:[%s1490_s21 + $0xc0] sm:$0xff]  ;;  %v470_v16 = vld [vmem:[%s1460_s16 + $0xc8] sm:$0xff]  ;;  %v507_v18 = vld [vmem:[%s1490_s21 + $0xb0] sm:$0xff] }
  0x64   : > { %518 = vmatpush.xpose.msra.mxu0 %v513_v6  ;;  %584 = vmatpush.xpose.msra.mxu3 %v474_v8  ;;  %v508_v19 = vld [vmem:[%s1490_s21 + $0xb8] sm:$0xff]  ;;  %v465_v21 = vld [vmem:[%s1460_s16 + $0xa0] sm:$0xff]  ;;  %v506_v23 = vld [vmem:[%s1490_s21 + $0xa8] sm:$0xff] }
  0x65   : > { %v468_v20 = vld [vmem:[%s1460_s16 + $0xb8] sm:$0xff]  ;;  %v505_v22 = vld [vmem:[%s1490_s21 + $0xa0] sm:$0xff]  ;;  %v466_v24 = vld [vmem:[%s1460_s16 + $0xa8] sm:$0xff] }
  0x66   : > { %v463_v25 = vld [vmem:[%s1460_s16 + $0x90] sm:$0xff]  ;;  %v504_v27 = vld [vmem:[%s1490_s21 + $0x98] sm:$0xff]  ;;  %v461_v29 = vld [vmem:[%s1460_s16 + $0x80] sm:$0xff] }
  0x67   : > { %565 = vmatpush.xpose.msra.mxu2 %v471_v9  ;;  %539 = vmatpush.xpose.msra.mxu1 %v512_v11  ;;  %v503_v26 = vld [vmem:[%s1490_s21 + $0x90] sm:$0xff]  ;;  %v464_v28 = vld [vmem:[%s1460_s16 + $0x98] sm:$0xff]  ;;  %v501_v30 = vld [vmem:[%s1490_s21 + $0x80] sm:$0xff] }
  0x68   : > { %519 = vmatpush.xpose.msra.mxu0 %v511_v10  ;;  %585 = vmatpush.xpose.msra.mxu3 %v472_v12  ;;  %v502_v31 = vld [vmem:[%s1490_s21 + $0x88] sm:$0xff]  ;;  %v459_v33 = vld [vmem:[%s1460_s16 + $0x70] sm:$0xff]  ;;  %v500_v35 = vld [vmem:[%s1490_s21 + $0x78] sm:$0xff] }
  0x69   : > { %v462_v32 = vld [vmem:[%s1460_s16 + $0x88] sm:$0xff]  ;;  %v499_v34 = vld [vmem:[%s1490_s21 + $0x70] sm:$0xff]  ;;  %v460_v36 = vld [vmem:[%s1460_s16 + $0x78] sm:$0xff] }
  0x6a   : > { %v457_v37 = vld [vmem:[%s1460_s16 + $0x60] sm:$0xff]  ;;  %v498_v39 = vld [vmem:[%s1490_s21 + $0x68] sm:$0xff]  ;;  %v455_v41 = vld [vmem:[%s1460_s16 + $0x50] sm:$0xff] }
  0x6b   : > { %566 = vmatpush.xpose.msra.mxu2 %v469_v13  ;;  %540 = vmatpush.xpose.msra.mxu1 %v510_v15  ;;  %v497_v38 = vld [vmem:[%s1490_s21 + $0x60] sm:$0xff]  ;;  %v458_v40 = vld [vmem:[%s1460_s16 + $0x68] sm:$0xff]  ;;  %v495_v42 = vld [vmem:[%s1490_s21 + $0x50] sm:$0xff] }
  0x6c   : > { %520 = vmatpush.xpose.msra.mxu0 %v509_v14  ;;  %586 = vmatpush.xpose.msra.mxu3 %v470_v16  ;;  %v496_v43 = vld [vmem:[%s1490_s21 + $0x58] sm:$0xff]  ;;  %v453_v45 = vld [vmem:[%s1460_s16 + $0x40] sm:$0xff]  ;;  %v494_v47 = vld [vmem:[%s1490_s21 + $0x48] sm:$0xff] }
  0x6d   : > { %v456_v44 = vld [vmem:[%s1460_s16 + $0x58] sm:$0xff]  ;;  %v493_v46 = vld [vmem:[%s1490_s21 + $0x40] sm:$0xff]  ;;  %v454_v48 = vld [vmem:[%s1460_s16 + $0x48] sm:$0xff] }
  0x6e   : > { %v451_v49 = vld [vmem:[%s1460_s16 + $0x30] sm:$0xff]  ;;  %v492_v51 = vld [vmem:[%s1490_s21 + $0x38] sm:$0xff]  ;;  %v449_v53 = vld [vmem:[%s1460_s16 + $0x20] sm:$0xff] }
  0x6f   : > { %567 = vmatpush.xpose.msra.mxu2 %v467_v17  ;;  %541 = vmatpush.xpose.msra.mxu1 %v508_v19  ;;  %v491_v50 = vld [vmem:[%s1490_s21 + $0x30] sm:$0xff]  ;;  %v452_v52 = vld [vmem:[%s1460_s16 + $0x38] sm:$0xff]  ;;  %v489_v54 = vld [vmem:[%s1490_s21 + $0x20] sm:$0xff] }
  0x70   : > { %521 = vmatpush.xpose.msra.mxu0 %v507_v18  ;;  %587 = vmatpush.xpose.msra.mxu3 %v468_v20  ;;  %v490_v55 = vld [vmem:[%s1490_s21 + $0x28] sm:$0xff]  ;;  %v477_v57 = vld [vmem:[%s430_s14] sm:$0x3]  ;;  %v447_v58 = vld [vmem:[%s1460_s16 + $0x10] sm:$0xff] }
  0x71   : > { %v450_v56 = vld [vmem:[%s1460_s16 + $0x28] sm:$0xff]  ;;  %v487_v59 = vld [vmem:[%s1490_s21 + $0x10] sm:$0xff]  ;;  %v488_v60 = vld [vmem:[%s1490_s21 + $0x18] sm:$0xff]  ;;  %v479_v62 = vperm.slane %v477_v57, 0  ;;  %v480_v0 = vperm.slane %v477_v57, 1 }
  0x72   : > { %v448_v61 = vld [vmem:[%s1460_s16 + $0x18] sm:$0xff]  ;;  %v443_v63 = vld [vmem:[%s352_s13] sm:$0xff]  ;;  %v486_v4 = vld [vmem:[%s1490_s21 + $0x8] sm:$0xff] }
  0x73   : > { %568 = vmatpush.xpose.msra.mxu2 %v465_v21  ;;  %542 = vmatpush.xpose.msra.mxu1 %v506_v23  ;;  %v445_v1 = vld [vmem:[%s1460_s16] sm:$0xff]  ;;  %v444_v3 = vld [vmem:[%s352_s13 + $0x8] sm:$0xff]  ;;  %v483_v6 = vmul.f32 %v479_v62, %v443_v63 }
  0x74   : > { %522 = vmatpush.xpose.msra.mxu0 %v505_v22  ;;  %588 = vmatpush.xpose.msra.mxu3 %v466_v24  ;;  %v485_v2 = vld [vmem:[%s1490_s21] sm:$0xff]  ;;  %v446_v5 = vld [vmem:[%s1460_s16 + $0x8] sm:$0xff]  ;;  %v484_v7 = vmul.f32 %v480_v0, %v444_v3  ;;  %v971_v9 = vld [vmem:[%s434_s2] ss:$0 sm:$0xff] }
  0x75   : > { %v557_v16 = vld [vmem:[#allocation2] sm:$0xff] }
  0x77   : > { %569 = vmatpush.xpose.msra.mxu2 %v463_v25  ;;  %543 = vmatpush.xpose.msra.mxu1 %v504_v27 }
  0x78   : > { %523 = vmatpush.xpose.msra.mxu0 %v503_v26  ;;  %589 = vmatpush.xpose.msra.mxu3 %v464_v28 }
  0x7b   : > { %570 = vmatpush.xpose.msra.mxu2 %v461_v29  ;;  %544 = vmatpush.xpose.msra.mxu1 %v502_v31 }
  0x7c   : > { %524 = vmatpush.xpose.msra.mxu0 %v501_v30  ;;  %590 = vmatpush.xpose.msra.mxu3 %v462_v32 }
  0x7f   : > { %571 = vmatpush.xpose.msra.mxu2 %v459_v33  ;;  %545 = vmatpush.xpose.msra.mxu1 %v500_v35 }
  0x80   : > { %525 = vmatpush.xpose.msra.mxu0 %v499_v34  ;;  %591 = vmatpush.xpose.msra.mxu3 %v460_v36 }
  0x83   : > { %572 = vmatpush.xpose.msra.mxu2 %v457_v37  ;;  %546 = vmatpush.xpose.msra.mxu1 %v498_v39 }
  0x84   : > { %526 = vmatpush.xpose.msra.mxu0 %v497_v38  ;;  %592 = vmatpush.xpose.msra.mxu3 %v458_v40 }
  0x87   : > { %573 = vmatpush.xpose.msra.mxu2 %v455_v41  ;;  %547 = vmatpush.xpose.msra.mxu1 %v496_v43 }
  0x88   : > { %527 = vmatpush.xpose.msra.mxu0 %v495_v42  ;;  %593 = vmatpush.xpose.msra.mxu3 %v456_v44 }
  0x8b   : > { %574 = vmatpush.xpose.msra.mxu2 %v453_v45  ;;  %548 = vmatpush.xpose.msra.mxu1 %v494_v47 }
  0x8c   : > { %528 = vmatpush.xpose.msra.mxu0 %v493_v46  ;;  %594 = vmatpush.xpose.msra.mxu3 %v454_v48 }
  0x8f   : > { %575 = vmatpush.xpose.msra.mxu2 %v451_v49  ;;  %549 = vmatpush.xpose.msra.mxu1 %v492_v51 }
  0x90   : > { %529 = vmatpush.xpose.msra.mxu0 %v491_v50  ;;  %595 = vmatpush.xpose.msra.mxu3 %v452_v52 }
  0x93   : > { %576 = vmatpush.xpose.msra.mxu2 %v449_v53  ;;  %550 = vmatpush.xpose.msra.mxu1 %v490_v55 }
  0x94   : > { %530 = vmatpush.xpose.msra.mxu0 %v489_v54  ;;  %596 = vmatpush.xpose.msra.mxu3 %v450_v56 }
  0x97   : > { %577 = vmatpush.xpose.msra.mxu2 %v447_v58  ;;  %551 = vmatpush.xpose.msra.mxu1 %v488_v60 }
  0x98   : > { %531 = vmatpush.xpose.msra.mxu0 %v487_v59  ;;  %597 = vmatpush.xpose.msra.mxu3 %v448_v61 }
  0x9b   : > { %578 = vmatpush.xpose.msra.mxu2 %v445_v1  ;;  %552 = vmatpush.xpose.msra.mxu1 %v486_v4 }
  0x9c   : > { %532 = vmatpush.xpose.msra.mxu0 %v485_v2  ;;  %598 = vmatpush.xpose.msra.mxu3 %v446_v5 }
  0x9e   : > { %579 = vmatmul.f32.vlgmr.msra.gmra.mxu2 %v443_v63  ;;  %553 = vmatmul.f32.vlgmr.msra.gmra.mxu1 %v484_v7 }
  0x9f   : > { %533 = vmatmul.f32.vlgmr.msra.gmra.mxu0 %v483_v6  ;;  %599 = vmatmul.f32.vlgmr.msra.gmra.mxu3 %v444_v3 }
 0x11b   : > { %v554_v10 = vpop.f32.mrf.mxu1 }
 0x11c   : > { %v534_v8 = vpop.f32.mrf.mxu0 }
 0x11d   : > { %v555_v11 = vadd.f32 %v554_v10, %v534_v8 }
 0x11f   : > { %v562_v12 = vmul.f32 %v971_v9, %v555_v11 }
 0x121   : > { %v580_v13 = vpop.f32.mrf.mxu2 }
 0x122   : > { %v581_v14 = vadd.f32 %v580_v13, %v562_v12  ;;  %v600_v15 = vpop.f32.mrf.mxu3 }
 0x124   : > { %v601_v17 = vadd.f32 %v600_v15, %v581_v14  ;;  %608 = sbr.rel (%p823_p11) target bundleno = 307 (0x133), region = 64 }
 0x126   : > { %v603_v18 = vadd.f32 %v601_v17, %v557_v16 }
 0x128   : > { %604 = vst [vmem:[#allocation2] sm:$0xff] %v603_v18 }
 0x129   : > { %v972_v20 = vld [vmem:[%s437_s1] ss:$0 sm:$0xff] }
 0x12f   : > { %v609_v19 = vld [vmem:[#allocation2] sm:$0xff] }
 0x130   : > { %v614_v21 = vadd.f32 %v972_v20, %v609_v19 }
 0x132   : > { %615 = vst [vmem:[%s421_s23] sm:$0xff] %v614_v21 }
 0x133 PF: > { %s825_s11 = sshll.u32 %s1201_s7, 3  ;;  %s1714_s18 = sld [smem:[#allocation30_spill]] }
 0x134   : > { %s631_s24 = sshll.u32 %s421_s23, 4  ;;  %s617_s6 = scalar_lea.sflag [#allocation5], %s419_s17  ;;  %s632_s24 = int_to_ptr.vmem [resolvable:$true] %s631_s24 }
 0x139   : > { %s629_s2 = scalar_lea.hbm %s1714_s18, %s825_s11  ;;  %s1083_s29 = scalar_lea.hbm %s1714_s18, 16 }
 0x13a   : > { %s633_s15 = sshll.u32 %s629_s2, 4  ;;  %s634_s15 = int_to_ptr.hbm [resolvable:$true] %s633_s15 }
 0x13b   : > { %s1077_s26 = sshra.s32 %s634_s15, 4  ;;  %s1078_s26 = int_to_ptr.hbm [resolvable:$true] %s1077_s26 }
 0x13c   : > { %s1079_s1 = scalar_lea.hbm %s1078_s26, 8  ;;  %p1084_p9 = scmp.lt.s32.totalorder %s1078_s26, %s1714_s18 }
 0x13d   : > { %p1080_p5 = scmp.ne.s32.totalorder %s1078_s26, %s1079_s1  ;;  %p1085_p10 = scmp.lt.s32.totalorder %s1083_s29, %s1079_s1 }
 0x13f   : > { %p1081_p0 = pnand %p1080_p5, %p1423_p1  ;;  %p1086_p12 = por %p1085_p10, %p1084_p9 }
 0x141   : > { %p1082_p8 = pneg %p1081_p0 }
 0x143   : > { %p1087_p13 = pnand %p1086_p12, %p1082_p8 }
 0x145   : > { %1090 = shalt.err (!%p1087_p13)
}
 0x146   : > { %837 = dma.vmem_to_hbm [thread:$0]  (%p1423_p1), %s632_s24, 128, %s634_s15, %s617_s6  }
 0x147 PF: > { %s1715_s17 = sld [smem:[#allocation13_spill]]  ;;  %p854_p6 = scmp.ge.s32.totalorder %s1213_s10, 2 }
 0x149   : > { %p850_p2 = pnand %p854_p6, %p1427_p3 }
 0x14b   : > { %p851_p4 = pneg %p850_p2 }
 0x14d   : > { %s645_s23 = sand.u32 1, %s1715_s17  }
 0x14e   : > { %s646_s20 = scalar_lea.sflag [#allocation5], %s645_s23 }
 0x14f   : > { %1156 = dma.done.wait (%p851_p4), %s646_s20, 128  }
 0x150   : > { %1158 = vsyncadd (%p851_p4), %s646_s20, 4294967168  ;;  %s25_s10 = sadd.s32 1, %s1213_s10   ;;  %s1718_s27 = sld [smem:[#allocation14_spill]] }
 0x151   : > { %p1603_p7 = scmp.ge.s32.totalorder %s25_s10, 6   ;;  %s1719_s23 = sld [smem:[#allocation23_spill]] }
 0x152   : > { %s1720_s9 = sld [smem:[#allocation15_spill]]  ;;  %s1727_s21 = smov %s1165_s22 }
 0x153   : > { %s1721_s26 = sld [smem:[#allocation22_spill]]  ;;  %s1729_s24 = smov %s1177_s25 }
 0x154   : > { %s1722_s13 = sld [smem:[#allocation16_spill]]  ;;  %s1733_s30 = smov %s1205_s8 }
 0x155   : > { %s1723_s29 = sld [smem:[#allocation21_spill]] }
 0x156   : > { %s1724_s7 = sld [smem:[#allocation17_spill]]  ;;  %s1728_s22 = smov %s1718_s27 }
 0x157   : > { %s1725_s16 = sld [smem:[#allocation19_spill]]  ;;  %s1731_s27 = smov %s1189_s28 }
 0x158   : > { %s1726_s14 = sld [smem:[#allocation20_spill]]  ;;  %s1730_s25 = smov %s1720_s9 }
 0x15a   : > { %s1732_s28 = smov %s1722_s13  ;;  %24 = sbr.rel (!%p1603_p7) target bundleno = 19 (0x13), region = 130 }
 0x15d   : > { %s1734_s8 = smov %s1725_s16 }
 0x15e   : > { %s1735_s9 = smov %s1726_s14 }
 0x15f   :  { %652 = vsyncpa [#allocation4], 1 }
 0x160   :  { %654 = vsyncpa [#allocation4 + $0x1], 1 }
 0x161   :  { %655 = vsyncpa [#allocation7], 1 }
 0x162   :  { %657 = vsyncpa [#allocation7 + $0x1], 1 }
 0x163   :  { %658 = vsyncpa [#allocation5], 1 }
 0x164   :  { %660 = vsyncpa [#allocation5 + $0x1], 1 }

</bundles_post_ra>
